<compile_context>
chip_gen: v7x
topology: tpu7x:2x2x1
jax: 0.10.0
libtpu: 0.0.40
codegen_flags: <defaults>
</compile_context>

<pallas_src>
import math

import jax
import jax.numpy as jnp
from jax.experimental import pallas as pl
from jax.experimental.pallas import tpu as pltpu


def _round_up(x: int, m: int) -> int:
    return ((x + m - 1) // m) * m


def _gather_kernel(ids_ref, table_ref, out_ref):
    # ids_ref   : (TM, 1)        int32   -- row ids for this output tile
    # table_ref : (V_pad, D_pad) f32     -- full stacked table, VMEM-resident
    # out_ref   : (TM, D_pad)    f32     -- gathered rows
    ids = ids_ref[...]                                   # (TM, 1)
    tm = out_ref.shape[0]
    v_pad = table_ref.shape[0]
    # One-hot selection matrix on the VPU, gather via one MXU matmul.
    sel = (ids == jax.lax.broadcasted_iota(jnp.int32, (tm, v_pad), 1)).astype(
        table_ref.dtype
    )                                                    # (TM, V_pad)
    out_ref[...] = jnp.dot(
        sel, table_ref[...], preferred_element_type=jnp.float32
    ).astype(out_ref.dtype)


def embedding_lookup(table: jax.Array, ids: jax.Array, *, max_tile: int = 256) -> jax.Array:
    """Pallas row-gather: out[m, :] = table[ids[m], :] (table kept VMEM-resident)."""
    ids = ids.astype(jnp.int32).reshape(-1)
    m = ids.shape[0]
    v, d = table.shape

    # Pad table to lane/sublane friendly shapes (guards for non-128 embed dims).
    v_pad = _round_up(v, 128)
    d_pad = _round_up(d, 128)
    if (v_pad, d_pad) != (v, d):
        table = jnp.pad(table, ((0, v_pad - v), (0, d_pad - d)))

    # Row-tile size: multiple of 8 sublanes, at most max_tile rows per grid step.
    m_pad = _round_up(m, 8)
    if m_pad > max_tile:
        tm = max_tile
        m_pad = _round_up(m, max_tile)
    else:
        tm = m_pad
    num_tiles = m_pad // tm

    # Ids as a (m_pad, 1) column so they land on sublanes; pad with 0 (valid row).
    ids_col = jnp.zeros((m_pad, 1), jnp.int32).at[:m, 0].set(ids)

    out = pl.pallas_call(
        _gather_kernel,
        out_shape=jax.ShapeDtypeStruct((m_pad, d_pad), table.dtype),
        grid_spec=pltpu.PrefetchScalarGridSpec(
            num_scalar_prefetch=0,
            grid=(num_tiles,),
            in_specs=[
                # ids tile for this grid step
                pl.BlockSpec((tm, 1), lambda i: (i, 0)),
                # full table, constant block index -> DMA'd to VMEM once
                pl.BlockSpec((v_pad, d_pad), lambda i: (0, 0)),
            ],
            out_specs=pl.BlockSpec((tm, d_pad), lambda i: (i, 0)),
        ),
        compiler_params=pltpu.CompilerParams(
            dimension_semantics=("parallel",),
        ),
    )(ids_col, table)

    return out[:m, :d]


def xavier_uniform(key, shape, dtype=jnp.float32):
    fan_in, fan_out = shape[0], shape[1]
    bound = math.sqrt(6.0 / (fan_in + fan_out))
    return jax.random.uniform(key, shape, dtype=dtype, minval=-bound, maxval=bound)


class DEmbeddingPallas:
    """JAX/Pallas equivalent of the PyTorch D_Embedding module."""

    def __init__(self, ent2id, rel2id, embed_dim, key):
        self.ent2id = ent2id
        self.rel2id = rel2id
        self.embed_dim = embed_dim
        k_ent, k_rel = jax.random.split(key)
        self.ent_transfer = xavier_uniform(k_ent, (len(ent2id), embed_dim))
        self.rel_transfer = xavier_uniform(k_rel, (len(rel2id), embed_dim))
        # Stacked table so h/r/t lookups fuse into a single kernel launch.
        self.num_ent = len(ent2id)
        self.combined_table = jnp.concatenate(
            [self.ent_transfer, self.rel_transfer], axis=0
        )

    def __call__(self, triples):
        # Python-side id mapping (pure glue, same as the torch module's list comps).
        b = len(triples)
        n = len(triples[0])
        h_id = jnp.array(
            [[self.ent2id[t[0]] for t in batch] for batch in triples], jnp.int32
        ).reshape(-1)
        r_id = jnp.array(
            [[self.rel2id[t[1]] for t in batch] for batch in triples], jnp.int32
        ).reshape(-1)
        t_id = jnp.array(
            [[self.ent2id[t[2]] for t in batch] for batch in triples], jnp.int32
        ).reshape(-1)

        # Fuse all three gathers: [h_ids ; r_ids + num_ent ; t_ids] on the stacked table.
        all_ids = jnp.concatenate([h_id, r_id + self.num_ent, t_id])
        rows = embedding_lookup(self.combined_table, all_ids)  # (3*B*N, D)

        m = b * n
        out_shape = (b, n, 1, self.embed_dim)
        h = rows[:m].reshape(out_shape)
        r = rows[m : 2 * m].reshape(out_shape)
        t = rows[2 * m :].reshape(out_shape)
        return h, r, t


if __name__ == "__main__":
    key = jax.random.PRNGKey(0)

    # Small synthetic dataset: 16 entities, 8 relations, embed_dim=128 (lane aligned).
    num_ent, num_rel, embed_dim = 16, 8, 128
    ent2id = {f"e{i}": i for i in range(num_ent)}
    rel2id = {f"r{i}": i for i in range(num_rel)}

    model = DEmbeddingPallas(ent2id, rel2id, embed_dim, key)

    # Deterministic triples: batch=2, 8 triples per batch.
    B, N = 2, 8
    k_h, k_r, k_t = jax.random.split(jax.random.PRNGKey(0), 3)
    h_ids = jax.random.randint(k_h, (B, N), 0, num_ent)
    r_ids = jax.random.randint(k_r, (B, N), 0, num_rel)
    t_ids = jax.random.randint(k_t, (B, N), 0, num_ent)
    triples = [
        [
            (f"e{int(h_ids[b, i])}", f"r{int(r_ids[b, i])}", f"e{int(t_ids[b, i])}")
            for i in range(N)
        ]
        for b in range(B)
    ]

    h_tr, r_tr, t_tr = model(triples)
    jax.block_until_ready((h_tr, r_tr, t_tr))

    # Reference check against plain-JAX gather.
    h_ref = model.ent_transfer[h_ids.reshape(-1)].reshape(B, N, 1, embed_dim)
    r_ref = model.rel_transfer[r_ids.reshape(-1)].reshape(B, N, 1, embed_dim)
    t_ref = model.ent_transfer[t_ids.reshape(-1)].reshape(B, N, 1, embed_dim)
    assert h_tr.shape == (B, N, 1, embed_dim)
    assert (
        jnp.allclose(h_tr, h_ref)
        and jnp.allclose(r_tr, r_ref)
        and jnp.allclose(t_tr, t_ref)
    )

    print("KERNEL_OK")
</pallas_src>

<mosaic_0001>
module attributes {stable_mosaic.version = 11 : i64} {
  func.func @_gather_kernel(%arg0: i32, %arg1: memref<48x1xi32, #tpu.memory_space<vmem>>, %arg2: memref<128x128xf32, #tpu.memory_space<vmem>>, %arg3: memref<48x128xf32, #tpu.memory_space<vmem>>) attributes {dimension_semantics = [#tpu.dimension_semantics<parallel>], iteration_bounds = array<i64: 1>, scalar_prefetch = 0 : i64, scratch_operands = 0 : i64, tpu.core_type = #tpu.core_type<tc>, window_params = [{transform_indices = @transform_0, window_bounds = array<i64: 48, 1>}, {pipeline_mode = #tpu.pipeline_mode<synchronous>, transform_indices = @transform_1, window_bounds = array<i64: 128, 128>}, {transform_indices = @transform_2, window_bounds = array<i64: 48, 128>}]} {
    %c0 = arith.constant 0 : index
    %c0_0 = arith.constant 0 : index
    %0 = vector.load %arg1[%c0, %c0_0] : memref<48x1xi32, #tpu.memory_space<vmem>>, vector<48x1xi32>
    %1 = tpu.iota {dimensions = array<i32: 1>} : vector<48x128xi32>
    %2 = vector.broadcast %0 : vector<48x1xi32> to vector<48x128xi32>
    %3 = arith.cmpi eq, %2, %1 : vector<48x128xi32>
    %4 = arith.extui %3 : vector<48x128xi1> to vector<48x128xi32>
    %5 = arith.sitofp %4 : vector<48x128xi32> to vector<48x128xf32>
    %c0_1 = arith.constant 0 : index
    %c0_2 = arith.constant 0 : index
    %6 = vector.load %arg2[%c0_1, %c0_2] : memref<128x128xf32, #tpu.memory_space<vmem>>, vector<128x128xf32>
    %cst = arith.constant dense<0.000000e+00> : vector<48x128xf32>
    %7 = tpu.matmul %5, %6, %cst {dimension_numbers = #tpu.dot_dimension_numbers<[1], [0], [0], [1], [0, 0, 1, 1], [], []>} : vector<48x128xf32>, vector<128x128xf32>, vector<48x128xf32> -> vector<48x128xf32>
    %c0_3 = arith.constant 0 : index
    %c0_4 = arith.constant 0 : index
    %8 = vector.load %arg3[%c0_3, %c0_4] : memref<48x128xf32, #tpu.memory_space<vmem>>, vector<48x128xf32>
    tpu.vector_store %arg3[%c0_3, %c0_4], %7 {strides = array<i32>} : memref<48x128xf32, #tpu.memory_space<vmem>>, vector<48x128xf32>,
    return
  }
  func.func @transform_0(%arg0: i32) -> (i32, i32) {
    %c0_i32 = arith.constant 0 : i32
    %c0_i32_0 = arith.constant 0 : i32
    return %arg0, %c0_i32 : i32, i32
  }
  func.func @transform_1(%arg0: i32) -> (i32, i32) {
    %c0_i32 = arith.constant 0 : i32
    %c0_i32_0 = arith.constant 0 : i32
    %c0_i32_1 = arith.constant 0 : i32
    return %c0_i32, %c0_i32_0 : i32, i32
  }
  func.func @transform_2(%arg0: i32) -> (i32, i32) {
    %c0_i32 = arith.constant 0 : i32
    %c0_i32_0 = arith.constant 0 : i32
    return %arg0, %c0_i32 : i32, i32
  }
}

</mosaic_0001>

<bundles_post_ra>
// kernel: tpu_custom_call.1
= control target key start
LH: loop header
LB: loop body
LE: loop exit
PB: predicated region body
PF: predicated region fallthrough
CT: control target
= control target key end

     0   :  { %7 = vsyncpa [#allocation3], 0  ;;  %s452_s0 = inlined_call_operand.vmem [shape: s32[48,1], index: 0, kind: input, shape index: {}]   ;;  %s453_s1 = inlined_call_operand.hbm [shape: f32[128,128], index: 1, kind: input, shape index: {}]   ;;  %s454_s2 = inlined_call_operand.hbm [shape: f32[48,128], index: 2, kind: output, shape index: {}]  }
   0x1   :  { %8 = vsyncpa [#allocation4], 0  ;;  %s383_s9 = smov [#allocation2]   ;;  %s335_s13 = scalar_lea.hbm %s453_s1, 2048 }
   0x2   :  { %s16_s10 = sshll.u32 %s383_s9, 4  ;;  %p336_p0 = scmp.ne.s32.totalorder %s453_s1, %s335_s13  ;;  %s17_s10 = int_to_ptr.vmem [resolvable:$true] %s16_s10 }
   0x3   :  { %p339_p1 = scmp.lt.u32.totalorder %s335_s13, %s453_s1 }
   0x5   :  { %p341_p2 = pnand %p339_p1, %p336_p0 }
   0x7   :  { %344 = shalt.err (!%p341_p2)
}
   0x8   :  { %s345_s18 = scalar_lea.vmem %s17_s10, 2048  ;;  %p350_p4 = scmp.lt.s32.totalorder %s17_s10, %s17_s10 }
   0x9   :  { %p346_p3 = scmp.ne.s32.totalorder %s17_s10, %s345_s18  ;;  %p351_p5 = scmp.lt.s32.totalorder %s345_s18, %s345_s18 }
   0xb   :  { %p352_p6 = por %p351_p5, %p350_p4 }
   0xd   :  { %p353_p7 = pnand %p352_p6, %p346_p3 }
   0xf   :  { %356 = shalt.err (!%p353_p7)
}
  0x10   :  { %s384_s19 = smov 128   ;;  %s385_s20 = smov 8  }
  0x11   :  { %22 = dma.hbm_to_vmem [thread:$0]  %s453_s1, 2048, %s17_s10, [#allocation3], %s384_s19, %s384_s19, %s385_s20  }
  0x12   :  { %379 = dma.done.wait [#allocation3], 2048  }
  0x13   :  { %380 = vsyncadd [#allocation3], 4294965248  ;;  %v386_v0 = vmov 0   ;;  %v28_v1 = vld [vmem:[%s452_s0 + $0x10] sm:$0xff]  ;;  %v26_v2 = vld [vmem:[%s452_s0] sm:$0xff]  ;;  %v32_v31 = vlaneseq  ;;  %v387_v35 = vmov 1.0  }
  0x14   :  { %334 = vset.pattern.permute.xlu1 %v386_v0  ;;  %333 = vset.pattern.permute.xlu0 %v386_v0  ;;  %v29_v3 = vld [vmem:[%s452_s0 + $0x18] sm:$0xff]  ;;  %v30_v4 = vld [vmem:[%s452_s0 + $0x20] sm:$0xff]  ;;  %v71_v6 = vld [vmem:[#allocation2 + $0x8] sm:$0xff] }
  0x15   :  { %41 = vperm.xlu0 %333, %v28_v1   ;;  %35 = vperm.xlu1 %334, %v26_v2   ;;  %v70_v5 = vld [vmem:[#allocation2] sm:$0xff]  ;;  %v72_v7 = vld [vmem:[#allocation2 + $0x10] sm:$0xff]  ;;  %v73_v9 = vld [vmem:[#allocation2 + $0x18] sm:$0xff]  ;;  %v33_v32 = vand.u32 127, %v32_v31 }
  0x16   :  { %v279_v8 = vpack.c.bf16 %v71_v6, %v70_v5  ;;  %v283_v10 = vpack.c.bf16 %v73_v9, %v72_v7  ;;  %v74_v11 = vld [vmem:[#allocation2 + $0x20] sm:$0xff]  ;;  %v75_v12 = vld [vmem:[#allocation2 + $0x28] sm:$0xff]  ;;  %v76_v16 = vld [vmem:[#allocation2 + $0x30] sm:$0xff] }
  0x17   :  { %v27_v13 = vld [vmem:[%s452_s0 + $0x8] sm:$0xff]  ;;  %v287_v15 = vpack.c.bf16 %v75_v12, %v74_v11  ;;  %v77_v17 = vld [vmem:[#allocation2 + $0x38] sm:$0xff]  ;;  %v78_v19 = vld [vmem:[#allocation2 + $0x40] sm:$0xff] }
  0x18   :  { %v31_v14 = vld [vmem:[%s452_s0 + $0x28] sm:$0xff]  ;;  %311 = vmatprep.subr.bf16.mxu1 %v279_v8  ;;  %280 = vmatprep.subr.bf16.mxu0 %v279_v8  ;;  %v291_v18 = vpack.c.bf16 %v77_v17, %v76_v16  ;;  %v80_v22 = vld [vmem:[#allocation2 + $0x50] sm:$0xff]  ;;  %v81_v23 = vld [vmem:[#allocation2 + $0x58] sm:$0xff]  ;;  %s388_s0 = smov [#allocation5]  }
  0x19   :  { %44 = vperm.xlu0 %333, %v29_v3   ;;  %47 = vperm.xlu1 %334, %v30_v4   ;;  %v79_v20 = vld [vmem:[#allocation2 + $0x48] sm:$0xff]  ;;  %v299_v24 = vpack.c.bf16 %v81_v23, %v80_v22  ;;  %v82_v25 = vld [vmem:[#allocation2 + $0x60] sm:$0xff]  ;;  %v84_v28 = vld [vmem:[#allocation2 + $0x70] sm:$0xff]  ;;  %s192_s6 = sshll.u32 %s388_s0, 4  ;;  %s193_s6 = int_to_ptr.vmem [resolvable:$true] %s192_s6 }
  0x1a   :  { %319 = vmatpush3.bf16.msra.mxu1 %v279_v8  ;;  %282 = vmatpush3.bf16.msra.mxu0 %v279_v8  ;;  %v295_v21 = vpack.c.bf16 %v79_v20, %v78_v19  ;;  %v83_v26 = vld [vmem:[#allocation2 + $0x68] sm:$0xff]  ;;  %v85_v29 = vld [vmem:[#allocation2 + $0x78] sm:$0xff]  ;;  %s357_s7 = scalar_lea.vmem %s193_s6, 768  ;;  %p362_p9 = scmp.lt.s32.totalorder %s193_s6, %s193_s6 }
  0x1b   :  { %312 = vmatprep.subr.bf16.mxu1 %v283_v10  ;;  %284 = vmatprep.subr.bf16.mxu0 %v283_v10  ;;  %v303_v27 = vpack.c.bf16 %v83_v26, %v82_v25  ;;  %v307_v30 = vpack.c.bf16 %v85_v29, %v84_v28  ;;  %p358_p8 = scmp.ne.s32.totalorder %s193_s6, %s357_s7  ;;  %p363_p10 = scmp.lt.s32.totalorder %s357_s7, %s357_s7 }
  0x1d   :  { %38 = vperm.xlu0 %333, %v27_v13   ;;  %50 = vperm.xlu1 %334, %v31_v14   ;;  %p364_p11 = por %p363_p10, %p362_p9 }
  0x1e   :  { %320 = vmatpush3.bf16.msra.mxu1 %v283_v10  ;;  %286 = vmatpush3.bf16.msra.mxu0 %v283_v10 }
  0x1f   :  { %313 = vmatprep.subr.bf16.mxu1 %v287_v15  ;;  %288 = vmatprep.subr.bf16.mxu0 %v287_v15  ;;  %p365_p12 = pnand %p364_p11, %p358_p8 }
  0x22   :  { %321 = vmatpush3.bf16.msra.mxu1 %v287_v15  ;;  %290 = vmatpush3.bf16.msra.mxu0 %v287_v15 }
  0x23   :  { %314 = vmatprep.subr.bf16.mxu1 %v291_v18  ;;  %292 = vmatprep.subr.bf16.mxu0 %v291_v18 }
  0x26   :  { %322 = vmatpush3.bf16.msra.mxu1 %v291_v18  ;;  %294 = vmatpush3.bf16.msra.mxu0 %v291_v18 }
  0x27   :  { %315 = vmatprep.subr.bf16.mxu1 %v295_v21  ;;  %296 = vmatprep.subr.bf16.mxu0 %v295_v21 }
  0x2a   :  { %323 = vmatpush3.bf16.msra.mxu1 %v295_v21  ;;  %298 = vmatpush3.bf16.msra.mxu0 %v295_v21 }
  0x2b   :  { %316 = vmatprep.subr.bf16.mxu1 %v299_v24  ;;  %300 = vmatprep.subr.bf16.mxu0 %v299_v24 }
  0x2e   :  { %324 = vmatpush3.bf16.msra.mxu1 %v299_v24  ;;  %302 = vmatpush3.bf16.msra.mxu0 %v299_v24 }
  0x2f   :  { %317 = vmatprep.subr.bf16.mxu1 %v303_v27  ;;  %304 = vmatprep.subr.bf16.mxu0 %v303_v27 }
  0x32   :  { %325 = vmatpush3.bf16.msra.mxu1 %v303_v27  ;;  %306 = vmatpush3.bf16.msra.mxu0 %v303_v27 }
  0x33   :  { %318 = vmatprep.subr.bf16.mxu1 %v307_v30  ;;  %308 = vmatprep.subr.bf16.mxu0 %v307_v30 }
  0x36   :  { %326 = vmatpush3.bf16.msra.mxu1 %v307_v30  ;;  %310 = vmatpush3.bf16.msra.mxu0 %v307_v30 }
  0x94   :  { %v42_v33 = vpop.permute.xlu0 %41  ;;  %v36_v34 = vpop.permute.xlu1 %35 }
  0x95   :  { %vm52_vm0 = vcmp.eq.s32.totalorder %v36_v34, %v33_v32  ;;  %vm54_vm1 = vcmp.eq.s32.totalorder %v42_v33, %v33_v32 }
  0x96   :  { %270 = vmatprep.mubr.msk.f32.mxu0 %vm52_vm0, %v387_v35  ;;  %273 = vmatprep.mubr.msk.f32.mxu1 %vm54_vm1, %v387_v35 }
  0x98   :  { %v45_v36 = vpop.permute.xlu0 %44  ;;  %v48_v37 = vpop.permute.xlu1 %47 }
  0x99   :  { %vm55_vm2 = vcmp.eq.s32.totalorder %v45_v36, %v33_v32  ;;  %vm56_vm3 = vcmp.eq.s32.totalorder %v48_v37, %v33_v32 }
  0x9a   :  { %274 = vmatmul.mubr.msk.f32.vlgmr.msra.gmra.mrb[0].mxu1 %vm55_vm2, %v387_v35 }
  0x9b   :  { %276 = vmatprep.mubr.msk.f32.mxu1 %vm56_vm3, %v387_v35 }
  0x9c   :  { %v39_v38 = vpop.permute.xlu0 %38  ;;  %v51_v39 = vpop.permute.xlu1 %50 }
  0x9d   :  { %vm53_vm4 = vcmp.eq.s32.totalorder %v39_v38, %v33_v32  ;;  %vm57_vm5 = vcmp.eq.s32.totalorder %v51_v39, %v33_v32 }
  0x9e   :  { %271 = vmatmul.mubr.msk.f32.vlgmr.msra.gmra.mrb[0].mxu0 %vm53_vm4, %v387_v35  ;;  %277 = vmatmul.mubr.msk.f32.gmra.mrb[2].mxu1 %vm57_vm5, %v387_v35 }
 0x16d   :  { %v275_v40 = vpop.f32.mrb[0].mxu1 }
 0x16e   :  { %184 = vst [vmem:[#allocation5 + $0x18] sm:$0xff] %v275_v40  ;;  %v162_v41 = vpop.f32.mrb[1].mxu1 }
 0x16f   :  { %183 = vst [vmem:[#allocation5 + $0x10] sm:$0xff] %v162_v41 }
 0x171   :  { %v272_v42 = vpop.f32.mrb[0].mxu0  ;;  %v278_v43 = vpop.f32.mrb[2].mxu1 }
 0x172   :  { %182 = vst [vmem:[#allocation5 + $0x8] sm:$0xff] %v272_v42  ;;  %186 = vst [vmem:[#allocation5 + $0x28] sm:$0xff] %v278_v43  ;;  %v152_v44 = vpop.f32.mrb[1].mxu0  ;;  %v172_v45 = vpop.f32.mrb[3].mxu1 }
 0x173   :  { %181 = vst [vmem:[#allocation5] sm:$0xff] %v152_v44  ;;  %185 = vst [vmem:[#allocation5 + $0x20] sm:$0xff] %v172_v45 }
 0x174   :  { %368 = shalt.err (!%p365_p12)
}
 0x175   :  { %s369_s10 = scalar_lea.hbm %s454_s2, 768 }
 0x176   :  { %p370_p13 = scmp.ne.s32.totalorder %s454_s2, %s369_s10  ;;  %p373_p0 = scmp.lt.u32.totalorder %s369_s10, %s454_s2 }
 0x178   :  { %p375_p1 = pnand %p373_p0, %p370_p13 }
 0x17a   :  { %378 = shalt.err (!%p375_p1)
}
 0x17b   :  { %198 = dma.vmem_to_hbm [thread:$0]  %s193_s6, 768, %s454_s2, [#allocation4], %s384_s19, %s384_s19, %s385_s20  }
 0x17c   :  { %381 = dma.done.wait [#allocation4], 768  }
 0x17d   :  { %382 = vsyncadd [#allocation4], 4294966528 }
 0x17e   :  { %202 = vsyncpa [#allocation3], 1 }
 0x17f   :  { %203 = vsyncpa [#allocation4], 1 }

</bundles_post_ra>
